<compile_context>
chip_gen: v7x
topology: tpu7x:2x2x1
jax: 0.10.0
libtpu: 0.0.40
codegen_flags: <defaults>
</compile_context>

<pallas_src>
import functools

import jax
import jax.numpy as jnp
import numpy as np
from jax.experimental import pallas as pl
from jax.experimental.pallas import tpu as pltpu


# ----------------------------- Pallas kernel -------------------------------

def fused_conv_gap_head_kernel(patches_ref, w_conv_ref, b_conv_ref,
                               w_head_ref, b_head_ref, out_ref, acc_ref,
                               *, inv_hw):
    """Fused conv(im2col matmul) + bias + ReLU + GAP + linear head.

    Grid = (B, num_row_tiles).  Per step:
      patches_ref : [1, TM, K_pad]  bf16   (spatial tile of one image)
      w_conv_ref  : [K_pad, C_pad]  bf16
      b_conv_ref  : [1, C_pad]      f32
      w_head_ref  : [C_pad, NC_pad] f32
      b_head_ref  : [1, NC_pad]     f32
      out_ref     : [1, 8, NC_pad]  f32    (row 0 holds the logits)
      acc_ref     : [1, C_pad]      f32 VMEM scratch (pooled-sum accumulator)
    """
    s = pl.program_id(1)

    @pl.when(s == 0)
    def _():
        acc_ref[...] = jnp.zeros_like(acc_ref)

    x = patches_ref[0]                                        # [TM, K_pad] bf16
    y = jnp.dot(x, w_conv_ref[...],
                preferred_element_type=jnp.float32)           # MXU, f32 acc
    y = jnp.maximum(y + b_conv_ref[...], 0.0)                 # bias + ReLU (VPU)
    acc_ref[...] += jnp.sum(y, axis=0, keepdims=True)         # partial GAP sum

    @pl.when(s == pl.num_programs(1) - 1)
    def _():
        pooled = jnp.broadcast_to(acc_ref[...] * inv_hw,
                                  (8, acc_ref.shape[1]))      # [8, C_pad] f32
        logits = jnp.dot(pooled, w_head_ref[...],
                         preferred_element_type=jnp.float32) + b_head_ref[...]
        out_ref[0] = logits.astype(out_ref.dtype)             # lane-dense store


# ------------------------------- glue (JAX) --------------------------------

def _round_up(n, m):
    return ((n + m - 1) // m) * m


def _pick_row_tile(hw):
    """Largest row tile <= 512 dividing HW; prefer >= 2 grid steps."""
    for tm in (512, 256, 128, 64, 32, 16, 8):
        if hw % tm == 0 and hw // tm >= 2:
            return tm
    return hw


def _im2col(x_nchw, k=3, pad=1):
    """[B, C, H, W] -> [B, H*W, C*k*k] with (c, kh, kw) fastest-varying order."""
    B, C, H, W = x_nchw.shape
    xp = jnp.pad(x_nchw, ((0, 0), (0, 0), (pad, pad), (pad, pad)))
    taps = []
    for di in range(k):
        for dj in range(k):
            taps.append(xp[:, :, di:di + H, dj:dj + W])        # [B, C, H, W]
    p = jnp.stack(taps, axis=2)                                # [B, C, 9, H, W]
    p = p.transpose(0, 3, 4, 1, 2)                             # [B, H, W, C, 9]
    return p.reshape(B, H * W, C * k * k)


def custom_single_head_forward(x_nchw, params):
    """conv3x3 -> ReLU -> global avg pool -> linear head (single fused kernel)."""
    B, C_in, H, W = x_nchw.shape
    k = 3
    w_conv = params["w_conv"]            # [C_out, C_in, 3, 3] (PyTorch layout)
    b_conv = params["b_conv"]            # [C_out]
    w_head = params["w_head"]            # [num_classes, C_out] (PyTorch layout)
    b_head = params["b_head"]            # [num_classes]

    c_out = w_conv.shape[0]
    num_classes = w_head.shape[0]

    K = C_in * k * k
    K_pad = _round_up(K, 128)            # lane-dense matmul K
    C_pad = _round_up(c_out, 128)        # lane-dense matmul N
    NC_pad = _round_up(num_classes, 128) # lane-dense logits store
    HW = H * W
    TM = _pick_row_tile(HW)

    # Patches: [B, HW, K_pad] bf16 (zero-padded K).  bf16 halves HBM/VMEM bytes
    # and feeds the MXU its native dtype.
    patches = _im2col(x_nchw.astype(jnp.float32), k=k, pad=1)
    patches = jnp.pad(patches, ((0, 0), (0, 0), (0, K_pad - K)))
    patches = patches.astype(jnp.bfloat16)

    # Conv weight as [K_pad, C_pad] bf16 (zero-padded); column order matches im2col.
    w_mat = jnp.pad(w_conv.reshape(c_out, K).T.astype(jnp.float32),
                    ((0, K_pad - K), (0, C_pad - c_out))).astype(jnp.bfloat16)
    b_conv_p = jnp.pad(b_conv.astype(jnp.float32),
                       (0, C_pad - c_out)).reshape(1, C_pad)

    # Head stays f32 (tiny matmul, keeps logits accurate).
    w_head_p = jnp.pad(w_head.T.astype(jnp.float32),
                       ((0, C_pad - c_out), (0, NC_pad - num_classes)))
    b_head_p = jnp.pad(b_head.astype(jnp.float32),
                       (0, NC_pad - num_classes)).reshape(1, NC_pad)

    grid = (B, HW // TM)

    out = pl.pallas_call(
        functools.partial(fused_conv_gap_head_kernel, inv_hw=1.0 / float(HW)),
        out_shape=jax.ShapeDtypeStruct((B, 8, NC_pad), jnp.float32),
        grid_spec=pltpu.PrefetchScalarGridSpec(
            num_scalar_prefetch=0,
            grid=grid,
            in_specs=[
                # Spatial tile of one image; pipelined (double-buffered) over s.
                pl.BlockSpec((1, TM, K_pad), lambda b, s: (b, s, 0)),
                # Weights/biases: constant block index -> DMA'd once, stay resident.
                pl.BlockSpec((K_pad, C_pad), lambda b, s: (0, 0)),
                pl.BlockSpec((1, C_pad), lambda b, s: (0, 0)),
                pl.BlockSpec((C_pad, NC_pad), lambda b, s: (0, 0)),
                pl.BlockSpec((1, NC_pad), lambda b, s: (0, 0)),
            ],
            out_specs=pl.BlockSpec((1, 8, NC_pad), lambda b, s: (b, 0, 0)),
            scratch_shapes=[pltpu.VMEM((1, C_pad), jnp.float32)],
        ),
        compiler_params=pltpu.CompilerParams(
            # b is independent (shards across v7x's 2 TCs); s carries the GAP
            # accumulator so it must stay "arbitrary" and innermost.
            dimension_semantics=("parallel", "arbitrary"),
            # Explicit limit with headroom; safe on v5e/v6e (128 MiB) and v7x (64 MiB).
            vmem_limit_bytes=32 * 1024 * 1024,
        ),
    )(patches, w_mat, b_conv_p, w_head_p, b_head_p)

    return out[:, 0, :num_classes]                              # [B, num_classes]


# -------------------------------- reference --------------------------------

def _reference_forward(x_nchw, params):
    w_conv = params["w_conv"].astype(jnp.float32)
    b_conv = params["b_conv"].astype(jnp.float32)
    w_head = params["w_head"].astype(jnp.float32)
    b_head = params["b_head"].astype(jnp.float32)
    y = jax.lax.conv_general_dilated(
        x_nchw.astype(jnp.float32), w_conv,
        window_strides=(1, 1), padding="SAME",
        dimension_numbers=("NCHW", "OIHW", "NCHW"))
    y = y + b_conv[None, :, None, None]
    y = jnp.maximum(y, 0.0)
    pooled = jnp.mean(y, axis=(2, 3))                  # [B, C_out]
    return pooled @ w_head.T + b_head[None, :]


# ---------------------------------- main ------------------------------------

if __name__ == "__main__":
    B, C_in, H, W = 2, 4, 16, 16
    C_hidden, num_classes = 32, 10

    key = jax.random.PRNGKey(0)
    k1, k2, k3, k4, k5 = jax.random.split(key, 5)

    x = jax.random.normal(k1, (B, C_in, H, W), dtype=jnp.float32)
    params = {
        "w_conv": jax.random.normal(k2, (C_hidden, C_in, 3, 3),
                                    dtype=jnp.float32) * 0.1,
        "b_conv": jax.random.normal(k3, (C_hidden,), dtype=jnp.float32) * 0.1,
        "w_head": jax.random.normal(k4, (num_classes, C_hidden),
                                    dtype=jnp.float32) * 0.1,
        "b_head": jax.random.normal(k5, (num_classes,), dtype=jnp.float32) * 0.1,
    }

    logits = jax.jit(custom_single_head_forward)(x, params)
    logits = jax.block_until_ready(logits)

    ref = jax.block_until_ready(_reference_forward(x, params))
    # bf16 conv operands (f32 accumulation) -> relax tolerance vs. pure-f32 ref.
    np.testing.assert_allclose(np.asarray(logits), np.asarray(ref),
                               rtol=2e-2, atol=2e-2)

    print("KERNEL_OK")
</pallas_src>

<mosaic_0001>
module attributes {stable_mosaic.version = 11 : i64} {
  func.func @fused_conv_gap_head_kernel(%arg0: i32, %arg1: i32, %arg2: memref<1x128x128xbf16, #tpu.memory_space<vmem>>, %arg3: memref<128x128xbf16, #tpu.memory_space<vmem>>, %arg4: memref<1x128xf32, #tpu.memory_space<vmem>>, %arg5: memref<128x128xf32, #tpu.memory_space<vmem>>, %arg6: memref<1x128xf32, #tpu.memory_space<vmem>>, %arg7: memref<1x8x128xf32, #tpu.memory_space<vmem>>, %arg8: memref<1x128xf32, #tpu.memory_space<vmem>>) attributes {dimension_semantics = [#tpu.dimension_semantics<parallel>, #tpu.dimension_semantics<arbitrary>], iteration_bounds = array<i64: 2, 2>, scalar_prefetch = 0 : i64, scratch_operands = 1 : i64, tpu.core_type = #tpu.core_type<tc>, window_params = [{transform_indices = @transform_0, window_bounds = array<i64: 1, 128, 128>}, {pipeline_mode = #tpu.pipeline_mode<synchronous>, transform_indices = @transform_1, window_bounds = array<i64: 128, 128>}, {pipeline_mode = #tpu.pipeline_mode<synchronous>, transform_indices = @transform_2, window_bounds = array<i64: 1, 128>}, {pipeline_mode = #tpu.pipeline_mode<synchronous>, transform_indices = @transform_3, window_bounds = array<i64: 128, 128>}, {pipeline_mode = #tpu.pipeline_mode<synchronous>, transform_indices = @transform_4, window_bounds = array<i64: 1, 128>}, {transform_indices = @transform_5, window_bounds = array<i64: 1, 8, 128>}]} {
    %c0_i32 = arith.constant 0 : i32
    %0 = arith.cmpi eq, %arg1, %c0_i32 : i32
    %1 = arith.extui %0 : i1 to i32
    %c0_i32_0 = arith.constant 0 : i32
    %2 = arith.cmpi ne, %1, %c0_i32_0 : i32
    scf.if %2 {
      %cst_14 = arith.constant 0.000000e+00 : f32
      %20 = vector.broadcast %cst_14 : f32 to vector<1x128xf32>
      %c0_15 = arith.constant 0 : index
      %c0_16 = arith.constant 0 : index
      %21 = vector.load %arg8[%c0_15, %c0_16] : memref<1x128xf32, #tpu.memory_space<vmem>>, vector<1x128xf32>
      tpu.vector_store %arg8[%c0_15, %c0_16], %20 {strides = array<i32>} : memref<1x128xf32, #tpu.memory_space<vmem>>, vector<1x128xf32>,
    } else {
    }
    %c0 = arith.constant 0 : index
    %c0_1 = arith.constant 0 : index
    %c0_2 = arith.constant 0 : index
    %3 = vector.load %arg2[%c0, %c0_1, %c0_2] : memref<1x128x128xbf16, #tpu.memory_space<vmem>>, vector<1x128x128xbf16>
    %4 = vector.shape_cast %3 : vector<1x128x128xbf16> to vector<128x128xbf16>
    %c0_3 = arith.constant 0 : index
    %c0_4 = arith.constant 0 : index
    %5 = vector.load %arg3[%c0_3, %c0_4] : memref<128x128xbf16, #tpu.memory_space<vmem>>, vector<128x128xbf16>
    %cst = arith.constant dense<0.000000e+00> : vector<128x128xf32>
    %6 = tpu.matmul %4, %5, %cst {dimension_numbers = #tpu.dot_dimension_numbers<[1], [0], [0], [1], [0, 0, 1, 1], [], []>} : vector<128x128xbf16>, vector<128x128xbf16>, vector<128x128xf32> -> vector<128x128xf32>
    %c0_5 = arith.constant 0 : index
    %c0_6 = arith.constant 0 : index
    %7 = vector.load %arg4[%c0_5, %c0_6] : memref<1x128xf32, #tpu.memory_space<vmem>>, vector<1x128xf32>
    %8 = vector.broadcast %7 : vector<1x128xf32> to vector<128x128xf32>
    %9 = arith.addf %6, %8 : vector<128x128xf32>
    %cst_7 = arith.constant 0.000000e+00 : f32
    %10 = vector.broadcast %cst_7 : f32 to vector<128x128xf32>
    %11 = arith.maximumf %9, %10 : vector<128x128xf32>
    %c0_8 = arith.constant 0 : index
    %c0_9 = arith.constant 0 : index
    %12 = vector.load %arg8[%c0_8, %c0_9] : memref<1x128xf32, #tpu.memory_space<vmem>>, vector<1x128xf32>
    %cst_10 = arith.constant dense<0.000000e+00> : vector<128xf32>
    %13 = vector.multi_reduction <add>, %11, %cst_10 [0] : vector<128x128xf32> to vector<128xf32>
    %14 = vector.shape_cast %13 : vector<128xf32> to vector<1x128xf32>
    %15 = arith.addf %12, %14 : vector<1x128xf32>
    %c0_11 = arith.constant 0 : index
    %c0_12 = arith.constant 0 : index
    %16 = vector.load %arg8[%c0_11, %c0_12] : memref<1x128xf32, #tpu.memory_space<vmem>>, vector<1x128xf32>
    tpu.vector_store %arg8[%c0_11, %c0_12], %15 {strides = array<i32>} : memref<1x128xf32, #tpu.memory_space<vmem>>, vector<1x128xf32>,
    %c1_i32 = arith.constant 1 : i32
    %17 = arith.cmpi eq, %arg1, %c1_i32 : i32
    %18 = arith.extui %17 : i1 to i32
    %c0_i32_13 = arith.constant 0 : i32
    %19 = arith.cmpi ne, %18, %c0_i32_13 : i32
    scf.if %19 {
      %c0_14 = arith.constant 0 : index
      %c0_15 = arith.constant 0 : index
      %20 = vector.load %arg8[%c0_14, %c0_15] : memref<1x128xf32, #tpu.memory_space<vmem>>, vector<1x128xf32>
      %cst_16 = arith.constant 3.906250e-03 : f32
      %21 = vector.broadcast %cst_16 : f32 to vector<1x128xf32>
      %22 = arith.mulf %20, %21 : vector<1x128xf32>
      %23 = vector.shape_cast %22 : vector<1x128xf32> to vector<1x128xf32>
      %24 = vector.broadcast %23 : vector<1x128xf32> to vector<8x128xf32>
      %c0_17 = arith.constant 0 : index
      %c0_18 = arith.constant 0 : index
      %25 = vector.load %arg5[%c0_17, %c0_18] : memref<128x128xf32, #tpu.memory_space<vmem>>, vector<128x128xf32>
      %cst_19 = arith.constant dense<0.000000e+00> : vector<8x128xf32>
      %26 = tpu.matmul %24, %25, %cst_19 {dimension_numbers = #tpu.dot_dimension_numbers<[1], [0], [0], [1], [0, 0, 1, 1], [], []>} : vector<8x128xf32>, vector<128x128xf32>, vector<8x128xf32> -> vector<8x128xf32>
      %c0_20 = arith.constant 0 : index
      %c0_21 = arith.constant 0 : index
      %27 = vector.load %arg6[%c0_20, %c0_21] : memref<1x128xf32, #tpu.memory_space<vmem>>, vector<1x128xf32>
      %28 = vector.broadcast %27 : vector<1x128xf32> to vector<8x128xf32>
      %29 = arith.addf %26, %28 : vector<8x128xf32>
      %c0_22 = arith.constant 0 : index
      %c0_23 = arith.constant 0 : index
      %c0_24 = arith.constant 0 : index
      %30 = vector.load %arg7[%c0_22, %c0_23, %c0_24] : memref<1x8x128xf32, #tpu.memory_space<vmem>>, vector<1x8x128xf32>
      %31 = vector.shape_cast %30 : vector<1x8x128xf32> to vector<8x128xf32>
      %32 = vector.shape_cast %29 : vector<8x128xf32> to vector<1x8x128xf32>
      tpu.vector_store %arg7[%c0_22, %c0_23, %c0_24], %32 {strides = array<i32>} : memref<1x8x128xf32, #tpu.memory_space<vmem>>, vector<1x8x128xf32>,
    } else {
    }
    return
  }
  func.func @transform_0(%arg0: i32, %arg1: i32) -> (i32, i32, i32) {
    %c0_i32 = arith.constant 0 : i32
    %c0_i32_0 = arith.constant 0 : i32
    return %arg0, %arg1, %c0_i32 : i32, i32, i32
  }
  func.func @transform_1(%arg0: i32, %arg1: i32) -> (i32, i32) {
    %c0_i32 = arith.constant 0 : i32
    %c0_i32_0 = arith.constant 0 : i32
    %c0_i32_1 = arith.constant 0 : i32
    return %c0_i32, %c0_i32_0 : i32, i32
  }
  func.func @transform_2(%arg0: i32, %arg1: i32) -> (i32, i32) {
    %c0_i32 = arith.constant 0 : i32
    %c0_i32_0 = arith.constant 0 : i32
    %c0_i32_1 = arith.constant 0 : i32
    return %c0_i32, %c0_i32_0 : i32, i32
  }
  func.func @transform_3(%arg0: i32, %arg1: i32) -> (i32, i32) {
    %c0_i32 = arith.constant 0 : i32
    %c0_i32_0 = arith.constant 0 : i32
    %c0_i32_1 = arith.constant 0 : i32
    return %c0_i32, %c0_i32_0 : i32, i32
  }
  func.func @transform_4(%arg0: i32, %arg1: i32) -> (i32, i32) {
    %c0_i32 = arith.constant 0 : i32
    %c0_i32_0 = arith.constant 0 : i32
    %c0_i32_1 = arith.constant 0 : i32
    return %c0_i32, %c0_i32_0 : i32, i32
  }
  func.func @transform_5(%arg0: i32, %arg1: i32) -> (i32, i32, i32) {
    %c0_i32 = arith.constant 0 : i32
    %c0_i32_0 = arith.constant 0 : i32
    %c0_i32_1 = arith.constant 0 : i32
    return %arg0, %c0_i32, %c0_i32_0 : i32, i32, i32
  }
}

</mosaic_0001>

<bundles_post_ra>
// kernel: custom_single_head_forward.1
= control target key start
LH: loop header
LB: loop body
LE: loop exit
PB: predicated region body
PF: predicated region fallthrough
CT: control target
= control target key end

     0   :  { %s1010_s18 = smov 0   ;;  %s1012_s19 = smov 0   ;;  %s1157_s0 = inlined_call_operand.vmem [shape: bf16[2,256,128], index: 0, kind: input, shape index: {}]   ;;  %s1158_s1 = inlined_call_operand.vmem [shape: bf16[128,128], index: 1, kind: input, shape index: {}]   ;;  %s1159_s2 = inlined_call_operand.vmem [shape: f32[1,128], index: 2, kind: input, shape index: {}]   ;;  %s1160_s3 = inlined_call_operand.vmem [shape: f32[128,128], index: 3, kind: input, shape index: {}]   ;;  %s1161_s4 = inlined_call_operand.vmem [shape: f32[1,128], index: 4, kind: input, shape index: {}]   ;;  %s1162_s5 = inlined_call_operand.vmem [shape: f32[2,8,128], index: 5, kind: output, shape index: {}]  }
   0x1   :  { %s1014_s20 = smov 0   ;;  %s1016_s21 = smov 0  }
   0x2   :  { %s1018_s22 = smov 0  }
   0x3 LB: > { %s24_s23 = sadd.s32 1, %s966_s20  ;;  %s27_s24 = sadd.s32 1, %s970_s21  ;;  %s974_s22 = sphi %s1018_s22, %s15_s22   ;;  %s970_s21 = sphi %s1016_s21, %s1166_s21   ;;  %s966_s20 = sphi %s1014_s20, %s1165_s20   ;;  %s962_s19 = sphi %s1012_s19, %s1164_s19   ;;  %s958_s18 = sphi %s1010_s18, %s1163_s18  }
   0x4   : > { %p25_p0 = scmp.ge.s32.totalorder %s24_s23, 2  ;;  %p709_p1 = scmp.ge.s32.totalorder %s974_s22, 1 }
   0x5   : > { %p206_p2 = scmp.lt.s32.totalorder %s974_s22, 5 }
   0x6   : > { %s1168_s23 = smov (%p25_p0, %s24_s23), 0  ;;  %s1170_s24 = smov (!%p25_p0, %s27_s24), %s970_s21 }
   0x7   : > { %p207_p3 = pnand %p709_p1, %p206_p2  ;;  %p29_p4 = scmp.ge.s32.totalorder %s1170_s24, 2 }
   0x8   : > { %s710_s25 = sshll.u32 (!%p207_p3), %s958_s18, 4  ;;  %p238_p5 = scmp.lt.s32.totalorder (!%p207_p3), %s962_s19, 1 }
   0x9   : > { %s1172_s24 = smov (%p29_p4, %s1170_s24), 0  ;;  %210 = sbr.rel (%p207_p3) target bundleno = 549 (0x225), region = 40 }
   0xa   : > { %p240_p6 = scmp.lt.s32.totalorder (!%p207_p3), %s710_s25, 31  ;;  %p714_p7 = scmp.ne.s32.totalorder (!%p207_p3), %s958_s18, 0 }
  0x10   : > { %s1174_s19 = smov (!%p238_p5, %s962_s19), 1  ;;  %s1176_s25 = smov (!%p240_p6, %s710_s25), 31 }
  0x11   : > { %s711_s26 = sshll.u32 %s1174_s19, 5  ;;  %s713_s27 = sshll.u32 %s1174_s19, 3  ;;  %v976_v0 = vmov (!%p714_p7), 0.0  }
  0x12   : > { %s243_s28 = sadd.s32 %s711_s26, %s1176_s25  ;;  %s1046_s6 = scalar_lea.vmem %s1162_s5, %s713_s27  ;;  %256 = vst [vmem:[#allocation2] sm:$0x1] (!%p714_p7), %v976_v0 }
  0x13   : > { %s712_s7 = sshll.u32 %s243_s28, 2  ;;  %255 = sbr.rel (%p714_p7) target bundleno = 26 (0x1a), region = 44 }
  0x14   : > { %s1051_s10 = scalar_lea.vmem %s1157_s0, %s712_s7 }
  0x1a PF: > { %v920_v1 = vld [vmem:[%s1158_s1] sm:$0xff]   ;;  %v921_v2 = vld [vmem:[%s1158_s1 + $0x8] sm:$0xff]   ;;  %v922_v3 = vld [vmem:[%s1158_s1 + $0x10] sm:$0xff]   ;;  %p732_p8 = scmp.ne.s32.totalorder %s958_s18, 1 }
  0x1b   : > { %769 = vmatprep.subr.bf16.mxu0 %v920_v1  ;;  %860 = vmatprep.subr.bf16.mxu1 %v920_v1  ;;  %v923_v4 = vld [vmem:[%s1158_s1 + $0x18] sm:$0xff]   ;;  %v928_v5 = vld [vmem:[%s1051_s10] sm:$0xff]   ;;  %v925_v8 = vld [vmem:[%s1158_s1 + $0x28] sm:$0xff]   ;;  %vm978_vm0 = vmmov (!%p732_p8), 0  }
  0x1c   : > { %770 = vmatpush3.bf16.msra.mxu0 %v920_v1  ;;  %868 = vmatpush3.bf16.msra.mxu1 %v920_v1  ;;  %v924_v6 = vld [vmem:[%s1158_s1 + $0x20] sm:$0xff]   ;;  %v926_v9 = vld [vmem:[%s1158_s1 + $0x30] sm:$0xff]   ;;  %v927_v10 = vld [vmem:[%s1158_s1 + $0x38] sm:$0xff]  }
  0x1d   : > { %771 = vmatprep.subr.bf16.mxu0 %v921_v2  ;;  %861 = vmatprep.subr.bf16.mxu1 %v921_v2  ;;  %v932_v7 = vld [vmem:[%s1051_s10 + $0x20] sm:$0xff]   ;;  %v929_v11 = vld [vmem:[%s1051_s10 + $0x8] sm:$0xff]   ;;  %v930_v13 = vld [vmem:[%s1051_s10 + $0x10] sm:$0xff]  }
  0x1e   : > { %785 = vmatprep.mubr.bf16.mxu0 %v928_v5  ;;  %793 = vmatprep.mubr.bf16.mxu1 %v932_v7  ;;  %v933_v12 = vld [vmem:[%s1051_s10 + $0x28] sm:$0xff]   ;;  %v934_v14 = vld [vmem:[%s1051_s10 + $0x30] sm:$0xff]   ;;  %v931_v15 = vld [vmem:[%s1051_s10 + $0x18] sm:$0xff]  }
  0x1f   : > { %v935_v16 = vld [vmem:[%s1051_s10 + $0x38] sm:$0xff]   ;;  %v715_v17 = vld [vmem:[%s1159_s2] ss:$0 sm:$0xff] }
  0x20   : > { %772 = vmatpush3.bf16.msra.mxu0 %v921_v2  ;;  %869 = vmatpush3.bf16.msra.mxu1 %v921_v2 }
  0x21   : > { %773 = vmatprep.subr.bf16.mxu0 %v922_v3  ;;  %862 = vmatprep.subr.bf16.mxu1 %v922_v3 }
  0x24   : > { %774 = vmatpush3.bf16.msra.mxu0 %v922_v3  ;;  %870 = vmatpush3.bf16.msra.mxu1 %v922_v3 }
  0x25   : > { %775 = vmatprep.subr.bf16.mxu0 %v923_v4  ;;  %863 = vmatprep.subr.bf16.mxu1 %v923_v4 }
  0x28   : > { %776 = vmatpush3.bf16.msra.mxu0 %v923_v4  ;;  %871 = vmatpush3.bf16.msra.mxu1 %v923_v4 }
  0x29   : > { %777 = vmatprep.subr.bf16.mxu0 %v924_v6  ;;  %864 = vmatprep.subr.bf16.mxu1 %v924_v6 }
  0x2c   : > { %778 = vmatpush3.bf16.msra.mxu0 %v924_v6  ;;  %872 = vmatpush3.bf16.msra.mxu1 %v924_v6 }
  0x2d   : > { %779 = vmatprep.subr.bf16.mxu0 %v925_v8  ;;  %865 = vmatprep.subr.bf16.mxu1 %v925_v8 }
  0x30   : > { %780 = vmatpush3.bf16.msra.mxu0 %v925_v8  ;;  %873 = vmatpush3.bf16.msra.mxu1 %v925_v8 }
  0x31   : > { %781 = vmatprep.subr.bf16.mxu0 %v926_v9  ;;  %866 = vmatprep.subr.bf16.mxu1 %v926_v9 }
  0x34   : > { %782 = vmatpush3.bf16.msra.mxu0 %v926_v9  ;;  %874 = vmatpush3.bf16.msra.mxu1 %v926_v9 }
  0x35   : > { %783 = vmatprep.subr.bf16.mxu0 %v927_v10  ;;  %867 = vmatprep.subr.bf16.mxu1 %v927_v10 }
  0x38   : > { %784 = vmatpush3.bf16.msra.mxu0 %v927_v10  ;;  %875 = vmatpush3.bf16.msra.mxu1 %v927_v10 }
  0x3b   : > { %786 = vmatmul.mubr.bf16.vlgmr.msra.gmra.mrb[0].mxu0 %v929_v11  ;;  %794 = vmatmul.mubr.bf16.vlgmr.msra.gmra.mrb[0].mxu1 %v933_v12 }
  0x3c   : > { %789 = vmatprep.mubr.bf16.mxu0 %v930_v13  ;;  %797 = vmatprep.mubr.bf16.mxu1 %v934_v14 }
  0x43   : > { %790 = vmatmul.mubr.bf16.gmra.mrb[4].mxu0 %v931_v15  ;;  %798 = vmatmul.mubr.bf16.gmra.mrb[4].mxu1 %v935_v16 }
 0x10e   : > { %v787_v18 = vpop.f32.mrb[0].mxu0  ;;  %v795_v19 = vpop.f32.mrb[0].mxu1 }
 0x10f   : > { %v426_v20 = vpop.f32.mrb[1].mxu0  ;;  %v458_v21 = vpop.f32.mrb[1].mxu1  ;;  %v435_v27 = vadd.f32 %v787_v18, %v715_v17  ;;  %v467_v59 = vadd.f32 %v795_v19, %v715_v17 }
 0x110   : > { %v427_v22 = vadd.f32 %v715_v17, %v426_v20  ;;  %v788_v23 = vpop.f32.mrb[2].mxu0  ;;  %v796_v24 = vpop.f32.mrb[2].mxu1  ;;  %v459_v52 = vadd.f32 %v715_v17, %v458_v21 }
 0x111   : > { %v429_v25 = vpop.f32.mrb[3].mxu0  ;;  %v461_v26 = vpop.f32.mrb[3].mxu1  ;;  %v438_v30 = vadd.f32 %v788_v23, %v715_v17  ;;  %v491_v32 = vmax.f32 %v435_v27, 0.0  ;;  %v470_v62 = vadd.f32 %v796_v24, %v715_v17  ;;  %v499_v1 = vmax.f32 %v467_v59, 0.0  ;;  %v505_v23 = vld [vmem:[#allocation2] sm:$0x1] }
 0x112   : > { %v430_v28 = vadd.f32 %v715_v17, %v429_v25  ;;  %v489_v29 = vmax.f32 %v427_v22, 0.0  ;;  %v497_v57 = vmax.f32 %v459_v52, 0.0  ;;  %v462_v58 = vadd.f32 %v715_v17, %v461_v26  ;;  %v542_v26 = vld [vmem:[%s1160_s3 + $0x8] sm:$0xff] (!%p732_p8)  ;;  %v543_v27 = vld [vmem:[%s1160_s3 + $0x10] sm:$0xff] (!%p732_p8)  ;;  %v556_v52 = vld [vmem:[%s1160_s3 + $0x78] sm:$0xff] (!%p732_p8) }
 0x113   : > { %v492_v38 = vmax.f32 %v438_v30, 0.0  ;;  %v500_v3 = vmax.f32 %v470_v62, 0.0  ;;  %v544_v30 = vld [vmem:[%s1160_s3 + $0x18] sm:$0xff] (!%p732_p8) }
 0x114   : > { %v490_v31 = vmax.f32 %v430_v28, 0.0  ;;  %v498_v63 = vmax.f32 %v462_v58, 0.0  ;;  %v977_v28 = vmov (!%p732_p8), 0.0|0.0  }
 0x115   : > { %836 = vmatprep.subr.bf16.mxu0 (!%p732_p8), %v977_v28 }
 0x116   : > { %v506_v33 = vadd.f32 %v490_v31, %v489_v29  ;;  %v791_v34 = vpop.f32.mrb[4].mxu0  ;;  %v799_v35 = vpop.f32.mrb[4].mxu1  ;;  %v979_v31 = vmov (!%p732_p8), 0.0  }
 0x117   : > { %v442_v36 = vpop.f32.mrb[5].mxu0  ;;  %v474_v37 = vpop.f32.mrb[5].mxu1  ;;  %v451_v45 = vadd.f32 %v791_v34, %v715_v17  ;;  %v483_v7 = vadd.f32 %v799_v35, %v715_v17  ;;  %833 = vmatprep.mubr.msk.f32.mxu0 (!%p732_p8), %vm978_vm0, %v979_v31  ;;  %v546_v34 = vld [vmem:[%s1160_s3 + $0x28] sm:$0xff] (!%p732_p8) }
 0x118   : > { %v507_v39 = vadd.f32 %v506_v33, %v491_v32  ;;  %v443_v40 = vadd.f32 %v715_v17, %v442_v36  ;;  %v792_v41 = vpop.f32.mrb[6].mxu0  ;;  %v800_v42 = vpop.f32.mrb[6].mxu1  ;;  %v475_v0 = vadd.f32 %v715_v17, %v474_v37  ;;  %v840_v32 = vpack.c.bf16 (!%p732_p8), %v544_v30, %v543_v27  ;;  %v545_v33 = vld [vmem:[%s1160_s3 + $0x20] sm:$0xff] (!%p732_p8)  ;;  %v547_v36 = vld [vmem:[%s1160_s3 + $0x30] sm:$0xff] (!%p732_p8)  ;;  %v548_v37 = vld [vmem:[%s1160_s3 + $0x38] sm:$0xff] (!%p732_p8) }
 0x119   : > { %v445_v43 = vpop.f32.mrb[7].mxu0  ;;  %v477_v44 = vpop.f32.mrb[7].mxu1  ;;  %v454_v50 = vadd.f32 %v792_v41, %v715_v17  ;;  %v495_v53 = vmax.f32 %v451_v45, 0.0  ;;  %v486_v10 = vadd.f32 %v800_v42, %v715_v17  ;;  %v503_v12 = vmax.f32 %v483_v7, 0.0  ;;  %v551_v42 = vld [vmem:[%s1160_s3 + $0x50] sm:$0xff] (!%p732_p8) }
 0x11a   : > { %v493_v46 = vmax.f32 %v443_v40, 0.0  ;;  %v508_v47 = vadd.f32 %v507_v39, %v492_v38  ;;  %v446_v48 = vadd.f32 %v715_v17, %v445_v43  ;;  %v501_v5 = vmax.f32 %v475_v0, 0.0  ;;  %v549_v39 = vld [vmem:[%s1160_s3 + $0x40] sm:$0xff] (!%p732_p8)  ;;  %v550_v40 = vld [vmem:[%s1160_s3 + $0x48] sm:$0xff] (!%p732_p8)  ;;  %v552_v43 = vld [vmem:[%s1160_s3 + $0x58] sm:$0xff] (!%p732_p8) }
 0x11b   : > { %v496_v55 = vmax.f32 %v454_v50, 0.0  ;;  %v478_v6 = vadd.f32 %v715_v17, %v477_v44  ;;  %v504_v14 = vmax.f32 %v486_v10, 0.0  ;;  %v541_v17 = vld [vmem:[%s1160_s3] sm:$0xff] (!%p732_p8)  ;;  %v843_v35 = vpack.c.bf16 (!%p732_p8), %v546_v34, %v545_v33 }
 0x11c   : > { %v509_v49 = vadd.f32 %v508_v47, %v493_v46  ;;  %v494_v51 = vmax.f32 %v446_v48, 0.0  ;;  %v837_v29 = vpack.c.bf16 (!%p732_p8), %v542_v26, %v541_v17  ;;  %v846_v38 = vpack.c.bf16 (!%p732_p8), %v548_v37, %v547_v36  ;;  %v553_v46 = vld [vmem:[%s1160_s3 + $0x60] sm:$0xff] (!%p732_p8)  ;;  %v554_v47 = vld [vmem:[%s1160_s3 + $0x68] sm:$0xff] (!%p732_p8) }
 0x11d   : > { %v502_v11 = vmax.f32 %v478_v6, 0.0  ;;  %v849_v41 = vpack.c.bf16 (!%p732_p8), %v550_v40, %v549_v39  ;;  %v536_v44 = vlaneseq (!%p732_p8)  ;;  %v852_v45 = vpack.c.bf16 (!%p732_p8), %v552_v43, %v551_v42 }
 0x11e   : > { %v510_v54 = vadd.f32 %v509_v49, %v494_v51  ;;  %838 = vmatpush3.bf16.msra.mxu0 (!%p732_p8), %v837_v29  ;;  %v855_v49 = vpack.c.bf16 (!%p732_p8), %v554_v47, %v553_v46  ;;  %v555_v51 = vld [vmem:[%s1160_s3 + $0x70] sm:$0xff] (!%p732_p8) }
 0x11f   : > { %839 = vmatprep.subr.bf16.mxu0 (!%p732_p8), %v977_v28  ;;  %v537_v48 = vshrl.u32 (!%p732_p8), %v536_v44, 7 }
 0x120   : > { %v511_v56 = vadd.f32 %v510_v54, %v495_v53 }
 0x121   : > { %v538_v54 = vsub.s32 (!%p732_p8), 0, %v537_v48 }
 0x122   : > { %v512_v60 = vadd.f32 %v511_v56, %v496_v55  ;;  %841 = vmatpush3.bf16.msra.mxu0 (!%p732_p8), %v840_v32  ;;  %v858_v55 = vpack.c.bf16 (!%p732_p8), %v556_v52, %v555_v51 }
 0x123   : > { %842 = vmatprep.subr.bf16.mxu0 (!%p732_p8), %v977_v28 }
 0x124   : > { %v513_v61 = vadd.f32 %v512_v60, %v497_v57  ;;  %v733_v57 = vld [vmem:[%s1161_s4] ss:$0 sm:$0xff] (!%p732_p8) }
 0x126   : > { %v514_v2 = vadd.f32 %v513_v61, %v498_v63  ;;  %844 = vmatpush3.bf16.msra.mxu0 (!%p732_p8), %v843_v35 }
 0x127   : > { %845 = vmatprep.subr.bf16.mxu0 (!%p732_p8), %v977_v28 }
 0x128   : > { %v515_v4 = vadd.f32 %v514_v2, %v499_v1 }
 0x12a   : > { %v516_v8 = vadd.f32 %v515_v4, %v500_v3  ;;  %847 = vmatpush3.bf16.msra.mxu0 (!%p732_p8), %v846_v38 }
 0x12b   : > { %848 = vmatprep.subr.bf16.mxu0 (!%p732_p8), %v977_v28 }
 0x12c   : > { %v517_v9 = vadd.f32 %v516_v8, %v501_v5 }
 0x12e   : > { %v518_v13 = vadd.f32 %v517_v9, %v502_v11  ;;  %850 = vmatpush3.bf16.msra.mxu0 (!%p732_p8), %v849_v41 }
 0x12f   : > { %851 = vmatprep.subr.bf16.mxu0 (!%p732_p8), %v977_v28 }
 0x130   : > { %v519_v15 = vadd.f32 %v518_v13, %v503_v12 }
 0x132   : > { %v520_v16 = vadd.f32 %v519_v15, %v504_v14  ;;  %853 = vmatpush3.bf16.msra.mxu0 (!%p732_p8), %v852_v45 }
 0x133   : > { %854 = vmatprep.subr.bf16.mxu0 (!%p732_p8), %v977_v28 }
 0x134   : > { %v521_v18 = vrot.slane %v520_v16, 4 }
 0x136   : > { %v522_v19 = vadd.f32 %v521_v18, %v520_v16  ;;  %856 = vmatpush3.bf16.msra.mxu0 (!%p732_p8), %v855_v49 }
 0x137   : > { %857 = vmatprep.subr.bf16.mxu0 (!%p732_p8), %v977_v28 }
 0x138   : > { %v523_v20 = vrot.slane %v522_v19, 2 }
 0x13a   : > { %v524_v21 = vadd.f32 %v523_v20, %v522_v19  ;;  %859 = vmatpush3.bf16.msra.mxu0 (!%p732_p8), %v858_v55 }
 0x13c   : > { %v525_v22 = vrot.slane %v524_v21, 1  ;;  %532 = sbr.rel (%p732_p8) target bundleno = 549 (0x225), region = 48 }
 0x13e   : > { %v526_v24 = vadd.f32 %v525_v22, %v524_v21 }
 0x140   : > { %v527_v25 = vadd.f32 %v526_v24, %v505_v23 }
 0x142   : > { %528 = vst [vmem:[#allocation2] sm:$0x1] %v527_v25 }
 0x149   : > { %v533_v50 = vld [vmem:[#allocation2] sm:$0x1] }
 0x14a   : > { %v534_v53 = vmul.f32 0.00390625, %v533_v50 }
 0x14c   : > { %v539_v56 = vrot.slane %v534_v53, %v538_v54 }
 0x14e   : > { %834 = vmatmul.mubr.f32.vlgmr.msra.gmra.mrb[0].mxu0 %v539_v56 }
 0x221   : > { %v630_v58 = vpop.f32.mrb[0].mxu0 }
 0x222   : > { %v631_v59 = vadd.f32 %v733_v57, %v630_v58  ;;  %v835_v60 = vpop.f32.mrb[1].mxu0 }
 0x224   : > { %634 = vst [vmem:[%s1046_s6] sm:$0xff] %v631_v59 }
 0x225 PF: > { %s15_s22 = sadd.s32 1, %s974_s22   ;;  %s1163_s18 = smov %s966_s20 }
 0x226   : > { %p12_p9 = scmp.ge.s32.totalorder %s15_s22, 6   ;;  %s1164_s19 = smov %s970_s21 }
 0x227   : > { %s1165_s20 = smov %s1168_s23  ;;  %s1166_s21 = smov %s1172_s24 }
 0x228   :  { %14 = sbr.rel (!%p12_p9) target bundleno = 3 (0x3), region = 78 }

</bundles_post_ra>
